<compile_context>
chip_gen: v6e
topology: v6e:2x2x1
jax: 0.10.0
libtpu: 0.0.40
codegen_flags: <defaults>
</compile_context>

<pallas_src>
import jax
import jax.numpy as jnp
from jax.experimental import pallas as pl
from jax.experimental.pallas import tpu as pltpu


def _cxcywh_to_xyxy_scaled(b, scale):
    """(TB, Q, 4) cxcywh -> xyxy, scaled by (TB, 1, 4) [w, h, w, h]."""
    b = b.astype(jnp.float32)
    xy = b[..., 0:2]
    half = 0.5 * b[..., 2:4]
    xyxy = jnp.concatenate([xy - half, xy + half], axis=-1)      # (TB, Q, 4)
    return xyxy * scale


def _hoi_postprocess_kernel(obj_logits_ref, verb_logits_ref, sub_boxes_ref,
                            obj_boxes_ref, scale_ref,
                            obj_scores_ref, obj_labels_ref, verb_scores_ref,
                            boxes_ref):
    # ---- object scores / labels without a full softmax ----
    #   softmax(x)[..., :-1].max(-1) == exp(max(x[..., :-1]) - logsumexp(x))
    #   argmax(softmax(x)[..., :-1]) == argmax(x[..., :-1])
    logits = obj_logits_ref[...].astype(jnp.float32)             # (TB, Q, Co)
    m_all = jnp.max(logits, axis=-1, keepdims=True)
    lse = m_all + jnp.log(jnp.sum(jnp.exp(logits - m_all), axis=-1,
                                  keepdims=True))                # (TB, Q, 1)
    body = logits[..., :-1]                                      # drop "no-object"
    m_body = jnp.max(body, axis=-1, keepdims=True)               # (TB, Q, 1)
    scores = jnp.exp(m_body - lse)                               # (TB, Q, 1)
    idx = jax.lax.broadcasted_iota(jnp.int32, body.shape, 2)
    labels = jnp.min(jnp.where(body == m_body, idx, body.shape[-1]),
                     axis=-1)                                    # (TB, Q) first-max idx

    # lane-dense [TB, 1, Q] writes (Q on lanes)
    obj_scores_ref[...] = scores[..., 0][:, None, :]
    obj_labels_ref[...] = labels[:, None, :].astype(jnp.int32)

    # ---- verb scores: sigmoid(logits) * obj_score ----
    vl = verb_logits_ref[...].astype(jnp.float32)                # (TB, Q, Cv)
    verb_scores_ref[...] = jax.nn.sigmoid(vl) * scores

    # ---- boxes: cxcywh -> xyxy, scale, store each half directly ----
    scale = scale_ref[...]                                       # (TB, 1, 4)
    Q = sub_boxes_ref.shape[1]
    boxes_ref[:, 0:Q, :] = _cxcywh_to_xyxy_scaled(sub_boxes_ref[...], scale)
    boxes_ref[:, Q:2 * Q, :] = _cxcywh_to_xyxy_scaled(obj_boxes_ref[...], scale)


def post_process_hoi(outputs, target_sizes, path_id, subject_category_id):
    """JAX/Pallas equivalent of PostProcessHOI.forward."""
    obj_logits = outputs['pred_obj_logits'][:, path_id]          # [B, Q, Co]
    verb_logits = outputs['pred_verb_logits'][:, path_id]        # [B, Q, Cv]
    sub_boxes = outputs['pred_sub_boxes'][:, path_id]            # [B, Q, 4]
    obj_boxes = outputs['pred_obj_boxes'][:, path_id]            # [B, Q, 4]

    assert obj_logits.shape[0] == target_sizes.shape[0]
    assert target_sizes.shape[1] == 2

    B, Q, Co = obj_logits.shape
    Cv = verb_logits.shape[-1]

    img_h = target_sizes[:, 0].astype(jnp.float32)
    img_w = target_sizes[:, 1].astype(jnp.float32)
    scale_fct = jnp.stack([img_w, img_h, img_w, img_h], axis=1)[:, None, :]  # [B,1,4]

    # One grid step on 1-TC chips; 2-way parallel split when B is even so both
    # v7x TensorCores get work.  Only the leading batch dim is tiled.
    grid_b = 2 if (B % 2 == 0 and B >= 2) else 1
    TB = B // grid_b

    out_shapes = (
        jax.ShapeDtypeStruct((B, 1, Q), jnp.float32),      # obj_scores (Q on lanes)
        jax.ShapeDtypeStruct((B, 1, Q), jnp.int32),        # obj_labels (Q on lanes)
        jax.ShapeDtypeStruct((B, Q, Cv), jnp.float32),     # verb_scores (already * obj_score)
        jax.ShapeDtypeStruct((B, 2 * Q, 4), jnp.float32),  # fused [sub; obj] xyxy, scaled
    )

    grid_spec = pltpu.PrefetchScalarGridSpec(
        num_scalar_prefetch=0,
        grid=(grid_b,),
        in_specs=[
            pl.BlockSpec((TB, Q, Co), lambda b: (b, 0, 0)),
            pl.BlockSpec((TB, Q, Cv), lambda b: (b, 0, 0)),
            pl.BlockSpec((TB, Q, 4), lambda b: (b, 0, 0)),
            pl.BlockSpec((TB, Q, 4), lambda b: (b, 0, 0)),
            pl.BlockSpec((TB, 1, 4), lambda b: (b, 0, 0)),
        ],
        out_specs=[
            pl.BlockSpec((TB, 1, Q), lambda b: (b, 0, 0)),
            pl.BlockSpec((TB, 1, Q), lambda b: (b, 0, 0)),
            pl.BlockSpec((TB, Q, Cv), lambda b: (b, 0, 0)),
            pl.BlockSpec((TB, 2 * Q, 4), lambda b: (b, 0, 0)),
        ],
    )

    obj_scores3, obj_labels3, verb_scores, boxes = pl.pallas_call(
        _hoi_postprocess_kernel,
        out_shape=out_shapes,
        grid_spec=grid_spec,
        compiler_params=pltpu.CompilerParams(
            dimension_semantics=("parallel",)),
    )(obj_logits, verb_logits, sub_boxes, obj_boxes, scale_fct)

    obj_scores = obj_scores3[:, 0, :]   # [B, Q]
    obj_labels = obj_labels3[:, 0, :]   # [B, Q]

    # ---- batched result assembly (boxes already fused by the kernel) ----
    subj = jnp.full((B, Q), subject_category_id, dtype=obj_labels.dtype)
    labels_all = jnp.concatenate([subj, obj_labels], axis=1)     # [B, 2Q]
    ids = jnp.arange(2 * Q, dtype=jnp.int32)

    # TODO(synk): torch's per-image list-of-dicts + .to('cpu') is host-side
    # glue; here we only slice pre-batched device arrays per image.
    results = []
    for b in range(B):
        results.append({
            'labels': labels_all[b],
            'boxes': boxes[b],
            'verb_scores': verb_scores[b],
            'sub_ids': ids[:Q],
            'obj_ids': ids[Q:],
        })
    return results, (obj_scores, obj_labels, verb_scores, boxes)


# ---------------- pure-JAX reference for verification ----------------
def _box_cxcywh_to_xyxy(b):
    cx, cy, w, h = b[..., 0], b[..., 1], b[..., 2], b[..., 3]
    return jnp.stack([cx - 0.5 * w, cy - 0.5 * h, cx + 0.5 * w, cy + 0.5 * h], axis=-1)


def _reference(outputs, target_sizes, path_id):
    ol = outputs['pred_obj_logits'][:, path_id]
    vl = outputs['pred_verb_logits'][:, path_id]
    sb = outputs['pred_sub_boxes'][:, path_id]
    ob = outputs['pred_obj_boxes'][:, path_id]
    prob = jax.nn.softmax(ol, axis=-1)
    scores = jnp.max(prob[..., :-1], axis=-1)
    labels = jnp.argmax(prob[..., :-1], axis=-1).astype(jnp.int32)
    vs = jax.nn.sigmoid(vl) * scores[..., None]
    h, w = target_sizes[:, 0].astype(jnp.float32), target_sizes[:, 1].astype(jnp.float32)
    scale = jnp.stack([w, h, w, h], axis=1)[:, None, :]
    return scores, labels, vs, _box_cxcywh_to_xyxy(sb) * scale, _box_cxcywh_to_xyxy(ob) * scale


if __name__ == "__main__":
    B, P, Q, Co, Cv = 2, 3, 8, 17, 8   # batch, paths, queries, obj classes(+no-obj), verbs
    path_id = 1
    subject_category_id = 0

    key = jax.random.PRNGKey(0)
    k1, k2, k3, k4 = jax.random.split(key, 4)
    outputs = {
        'pred_obj_logits': jax.random.normal(k1, (B, P, Q, Co), dtype=jnp.float32),
        'pred_verb_logits': jax.random.normal(k2, (B, P, Q, Cv), dtype=jnp.float32),
        'pred_sub_boxes': jax.random.uniform(k3, (B, P, Q, 4), dtype=jnp.float32,
                                             minval=0.1, maxval=0.9),
        'pred_obj_boxes': jax.random.uniform(k4, (B, P, Q, 4), dtype=jnp.float32,
                                             minval=0.1, maxval=0.9),
    }
    target_sizes = jnp.array([[480.0, 640.0], [512.0, 768.0]], dtype=jnp.float32)

    results, raw = post_process_hoi(outputs, target_sizes, path_id, subject_category_id)
    jax.block_until_ready(raw)

    obj_scores, obj_labels, verb_scores, boxes = raw
    ref_scores, ref_labels, ref_vs, ref_sub, ref_obj = _reference(outputs, target_sizes, path_id)

    checks = [
        (obj_scores, ref_scores),
        (obj_labels.astype(jnp.float32), ref_labels.astype(jnp.float32)),
        (verb_scores, ref_vs),
        (boxes[:, :Q, :], ref_sub),
        (boxes[:, Q:, :], ref_obj),
    ]
    for got, want in checks:
        assert got.shape == want.shape, (got.shape, want.shape)
        assert jnp.allclose(got, want, atol=1e-4, rtol=1e-4), "mismatch vs reference"

    assert results[0]['labels'].shape == (2 * Q,)
    assert results[0]['boxes'].shape == (2 * Q, 4)
    assert results[0]['verb_scores'].shape == (Q, Cv)
    assert results[0]['sub_ids'].shape == (Q,)
    assert results[0]['obj_ids'].shape == (Q,)

    print("KERNEL_OK")
</pallas_src>

<mosaic_0001>
module attributes {stable_mosaic.version = 11 : i64} {
  func.func @_hoi_postprocess_kernel(%arg0: i32, %arg1: memref<1x8x17xf32, #tpu.memory_space<vmem>>, %arg2: memref<1x8x8xf32, #tpu.memory_space<vmem>>, %arg3: memref<1x8x4xf32, #tpu.memory_space<vmem>>, %arg4: memref<1x8x4xf32, #tpu.memory_space<vmem>>, %arg5: memref<1x1x4xf32, #tpu.memory_space<vmem>>, %arg6: memref<1x1x8xf32, #tpu.memory_space<vmem>>, %arg7: memref<1x1x8xi32, #tpu.memory_space<vmem>>, %arg8: memref<1x8x8xf32, #tpu.memory_space<vmem>>, %arg9: memref<1x16x4xf32, #tpu.memory_space<vmem>>) attributes {dimension_semantics = [#tpu.dimension_semantics<parallel>], iteration_bounds = array<i64: 2>, scalar_prefetch = 0 : i64, scratch_operands = 0 : i64, tpu.core_type = #tpu.core_type<tc>, window_params = [{transform_indices = @transform_0, window_bounds = array<i64: 1, 8, 17>}, {transform_indices = @transform_1, window_bounds = array<i64: 1, 8, 8>}, {transform_indices = @transform_2, window_bounds = array<i64: 1, 8, 4>}, {transform_indices = @transform_3, window_bounds = array<i64: 1, 8, 4>}, {transform_indices = @transform_4, window_bounds = array<i64: 1, 1, 4>}, {transform_indices = @transform_5, window_bounds = array<i64: 1, 1, 8>}, {transform_indices = @transform_6, window_bounds = array<i64: 1, 1, 8>}, {transform_indices = @transform_7, window_bounds = array<i64: 1, 8, 8>}, {transform_indices = @transform_8, window_bounds = array<i64: 1, 16, 4>}]} {
    %c0 = arith.constant 0 : index
    %c0_0 = arith.constant 0 : index
    %c0_1 = arith.constant 0 : index
    %0 = vector.load %arg1[%c0, %c0_0, %c0_1] : memref<1x8x17xf32, #tpu.memory_space<vmem>>, vector<1x8x17xf32>
    %cst = arith.constant dense<0xFF800000> : vector<1x8xf32>
    %1 = vector.multi_reduction <maximumf>, %0, %cst [2] : vector<1x8x17xf32> to vector<1x8xf32>
    %2 = vector.shape_cast %1 : vector<1x8xf32> to vector<1x8x1xf32>
    %3 = vector.broadcast %2 : vector<1x8x1xf32> to vector<1x8x17xf32>
    %4 = arith.subf %0, %3 : vector<1x8x17xf32>
    %5 = math.exp %4 : vector<1x8x17xf32>
    %cst_2 = arith.constant dense<0.000000e+00> : vector<1x8xf32>
    %6 = vector.multi_reduction <add>, %5, %cst_2 [2] : vector<1x8x17xf32> to vector<1x8xf32>
    %7 = vector.shape_cast %6 : vector<1x8xf32> to vector<1x8x1xf32>
    %8 = math.log %7 : vector<1x8x1xf32>
    %9 = arith.addf %2, %8 : vector<1x8x1xf32>
    %10 = vector.extract_strided_slice %0 {offsets = [0, 0, 0], sizes = [1, 8, 16], strides = [1, 1, 1]} : vector<1x8x17xf32> to vector<1x8x16xf32>
    %cst_3 = arith.constant dense<0xFF800000> : vector<1x8xf32>
    %11 = vector.multi_reduction <maximumf>, %10, %cst_3 [2] : vector<1x8x16xf32> to vector<1x8xf32>
    %12 = vector.shape_cast %11 : vector<1x8xf32> to vector<1x8x1xf32>
    %13 = arith.subf %12, %9 : vector<1x8x1xf32>
    %14 = math.exp %13 : vector<1x8x1xf32>
    %15 = tpu.iota {dimensions = array<i32: 2>} : vector<1x8x16xi32>
    %16 = vector.broadcast %12 : vector<1x8x1xf32> to vector<1x8x16xf32>
    %17 = arith.cmpf oeq, %10, %16 : vector<1x8x16xf32>
    %c16_i32 = arith.constant 16 : i32
    %18 = vector.broadcast %c16_i32 : i32 to vector<1x8x16xi32>
    %19 = arith.select %17, %15, %18 : vector<1x8x16xi1>, vector<1x8x16xi32>
    %cst_4 = arith.constant dense<2147483647> : vector<1x8xi32>
    %20 = vector.multi_reduction <minsi>, %19, %cst_4 [2] : vector<1x8x16xi32> to vector<1x8xi32>
    %21 = vector.shape_cast %14 : vector<1x8x1xf32> to vector<1x8xf32>
    %22 = vector.shape_cast %21 : vector<1x8xf32> to vector<1x1x8xf32>
    %c0_5 = arith.constant 0 : index
    %c0_6 = arith.constant 0 : index
    %c0_7 = arith.constant 0 : index
    %23 = vector.load %arg6[%c0_5, %c0_6, %c0_7] : memref<1x1x8xf32, #tpu.memory_space<vmem>>, vector<1x1x8xf32>
    tpu.vector_store %arg6[%c0_5, %c0_6, %c0_7], %22 {strides = array<i32>} : memref<1x1x8xf32, #tpu.memory_space<vmem>>, vector<1x1x8xf32>,
    %24 = vector.shape_cast %20 : vector<1x8xi32> to vector<1x1x8xi32>
    %c0_8 = arith.constant 0 : index
    %c0_9 = arith.constant 0 : index
    %c0_10 = arith.constant 0 : index
    %25 = vector.load %arg7[%c0_8, %c0_9, %c0_10] : memref<1x1x8xi32, #tpu.memory_space<vmem>>, vector<1x1x8xi32>
    tpu.vector_store %arg7[%c0_8, %c0_9, %c0_10], %24 {strides = array<i32>} : memref<1x1x8xi32, #tpu.memory_space<vmem>>, vector<1x1x8xi32>,
    %c0_11 = arith.constant 0 : index
    %c0_12 = arith.constant 0 : index
    %c0_13 = arith.constant 0 : index
    %26 = vector.load %arg2[%c0_11, %c0_12, %c0_13] : memref<1x8x8xf32, #tpu.memory_space<vmem>>, vector<1x8x8xf32>
    %27 = arith.negf %26 : vector<1x8x8xf32>
    %28 = math.exp %27 : vector<1x8x8xf32>
    %cst_14 = arith.constant 1.000000e+00 : f32
    %29 = vector.broadcast %cst_14 : f32 to vector<1x8x8xf32>
    %30 = arith.addf %29, %28 : vector<1x8x8xf32>
    %31 = arith.divf %29, %30 : vector<1x8x8xf32>
    %32 = vector.broadcast %14 : vector<1x8x1xf32> to vector<1x8x8xf32>
    %33 = arith.mulf %31, %32 : vector<1x8x8xf32>
    %c0_15 = arith.constant 0 : index
    %c0_16 = arith.constant 0 : index
    %c0_17 = arith.constant 0 : index
    %34 = vector.load %arg8[%c0_15, %c0_16, %c0_17] : memref<1x8x8xf32, #tpu.memory_space<vmem>>, vector<1x8x8xf32>
    tpu.vector_store %arg8[%c0_15, %c0_16, %c0_17], %33 {strides = array<i32>} : memref<1x8x8xf32, #tpu.memory_space<vmem>>, vector<1x8x8xf32>,
    %c0_18 = arith.constant 0 : index
    %c0_19 = arith.constant 0 : index
    %c0_20 = arith.constant 0 : index
    %35 = vector.load %arg5[%c0_18, %c0_19, %c0_20] : memref<1x1x4xf32, #tpu.memory_space<vmem>>, vector<1x1x4xf32>
    %c0_21 = arith.constant 0 : index
    %c0_22 = arith.constant 0 : index
    %c0_23 = arith.constant 0 : index
    %36 = vector.load %arg3[%c0_21, %c0_22, %c0_23] : memref<1x8x4xf32, #tpu.memory_space<vmem>>, vector<1x8x4xf32>
    %37 = vector.extract_strided_slice %36 {offsets = [0, 0, 0], sizes = [1, 8, 2], strides = [1, 1, 1]} : vector<1x8x4xf32> to vector<1x8x2xf32>
    %38 = vector.extract_strided_slice %36 {offsets = [0, 0, 2], sizes = [1, 8, 2], strides = [1, 1, 1]} : vector<1x8x4xf32> to vector<1x8x2xf32>
    %cst_24 = arith.constant 5.000000e-01 : f32
    %39 = vector.broadcast %cst_24 : f32 to vector<1x8x2xf32>
    %40 = arith.mulf %39, %38 : vector<1x8x2xf32>
    %41 = arith.subf %37, %40 : vector<1x8x2xf32>
    %42 = arith.addf %37, %40 : vector<1x8x2xf32>
    %43 = tpu.concatenate %41, %42 in 2 : vector<1x8x2xf32>, vector<1x8x2xf32> -> vector<1x8x4xf32>
    %44 = vector.broadcast %35 : vector<1x1x4xf32> to vector<1x8x4xf32>
    %45 = arith.mulf %43, %44 : vector<1x8x4xf32>
    %c0_25 = arith.constant 0 : index
    %c0_26 = arith.constant 0 : index
    %c0_27 = arith.constant 0 : index
    %46 = vector.load %arg9[%c0_25, %c0_26, %c0_27] : memref<1x16x4xf32, #tpu.memory_space<vmem>>, vector<1x8x4xf32>
    tpu.vector_store %arg9[%c0_25, %c0_26, %c0_27], %45 {strides = array<i32>} : memref<1x16x4xf32, #tpu.memory_space<vmem>>, vector<1x8x4xf32>,
    %c0_28 = arith.constant 0 : index
    %c0_29 = arith.constant 0 : index
    %c0_30 = arith.constant 0 : index
    %47 = vector.load %arg4[%c0_28, %c0_29, %c0_30] : memref<1x8x4xf32, #tpu.memory_space<vmem>>, vector<1x8x4xf32>
    %48 = vector.extract_strided_slice %47 {offsets = [0, 0, 0], sizes = [1, 8, 2], strides = [1, 1, 1]} : vector<1x8x4xf32> to vector<1x8x2xf32>
    %49 = vector.extract_strided_slice %47 {offsets = [0, 0, 2], sizes = [1, 8, 2], strides = [1, 1, 1]} : vector<1x8x4xf32> to vector<1x8x2xf32>
    %cst_31 = arith.constant 5.000000e-01 : f32
    %50 = vector.broadcast %cst_31 : f32 to vector<1x8x2xf32>
    %51 = arith.mulf %50, %49 : vector<1x8x2xf32>
    %52 = arith.subf %48, %51 : vector<1x8x2xf32>
    %53 = arith.addf %48, %51 : vector<1x8x2xf32>
    %54 = tpu.concatenate %52, %53 in 2 : vector<1x8x2xf32>, vector<1x8x2xf32> -> vector<1x8x4xf32>
    %55 = vector.broadcast %35 : vector<1x1x4xf32> to vector<1x8x4xf32>
    %56 = arith.mulf %54, %55 : vector<1x8x4xf32>
    %c0_32 = arith.constant 0 : index
    %c8 = arith.constant 8 : index
    %c0_33 = arith.constant 0 : index
    %57 = vector.load %arg9[%c0_32, %c8, %c0_33] : memref<1x16x4xf32, #tpu.memory_space<vmem>>, vector<1x8x4xf32>
    tpu.vector_store %arg9[%c0_32, %c8, %c0_33], %56 {strides = array<i32>} : memref<1x16x4xf32, #tpu.memory_space<vmem>>, vector<1x8x4xf32>,
    return
  }
  func.func @transform_0(%arg0: i32) -> (i32, i32, i32) {
    %c0_i32 = arith.constant 0 : i32
    %c0_i32_0 = arith.constant 0 : i32
    %c0_i32_1 = arith.constant 0 : i32
    return %arg0, %c0_i32, %c0_i32_0 : i32, i32, i32
  }
  func.func @transform_1(%arg0: i32) -> (i32, i32, i32) {
    %c0_i32 = arith.constant 0 : i32
    %c0_i32_0 = arith.constant 0 : i32
    %c0_i32_1 = arith.constant 0 : i32
    return %arg0, %c0_i32, %c0_i32_0 : i32, i32, i32
  }
  func.func @transform_2(%arg0: i32) -> (i32, i32, i32) {
    %c0_i32 = arith.constant 0 : i32
    %c0_i32_0 = arith.constant 0 : i32
    %c0_i32_1 = arith.constant 0 : i32
    return %arg0, %c0_i32, %c0_i32_0 : i32, i32, i32
  }
  func.func @transform_3(%arg0: i32) -> (i32, i32, i32) {
    %c0_i32 = arith.constant 0 : i32
    %c0_i32_0 = arith.constant 0 : i32
    %c0_i32_1 = arith.constant 0 : i32
    return %arg0, %c0_i32, %c0_i32_0 : i32, i32, i32
  }
  func.func @transform_4(%arg0: i32) -> (i32, i32, i32) {
    %c0_i32 = arith.constant 0 : i32
    %c0_i32_0 = arith.constant 0 : i32
    %c0_i32_1 = arith.constant 0 : i32
    return %arg0, %c0_i32, %c0_i32_0 : i32, i32, i32
  }
  func.func @transform_5(%arg0: i32) -> (i32, i32, i32) {
    %c0_i32 = arith.constant 0 : i32
    %c0_i32_0 = arith.constant 0 : i32
    %c0_i32_1 = arith.constant 0 : i32
    return %arg0, %c0_i32, %c0_i32_0 : i32, i32, i32
  }
  func.func @transform_6(%arg0: i32) -> (i32, i32, i32) {
    %c0_i32 = arith.constant 0 : i32
    %c0_i32_0 = arith.constant 0 : i32
    %c0_i32_1 = arith.constant 0 : i32
    return %arg0, %c0_i32, %c0_i32_0 : i32, i32, i32
  }
  func.func @transform_7(%arg0: i32) -> (i32, i32, i32) {
    %c0_i32 = arith.constant 0 : i32
    %c0_i32_0 = arith.constant 0 : i32
    %c0_i32_1 = arith.constant 0 : i32
    return %arg0, %c0_i32, %c0_i32_0 : i32, i32, i32
  }
  func.func @transform_8(%arg0: i32) -> (i32, i32, i32) {
    %c0_i32 = arith.constant 0 : i32
    %c0_i32_0 = arith.constant 0 : i32
    %c0_i32_1 = arith.constant 0 : i32
    return %arg0, %c0_i32, %c0_i32_0 : i32, i32, i32
  }
}

</mosaic_0001>

<bundles_post_ra>
// kernel: tpu_custom_call.1
= control target key start
LH: loop header
LB: loop body
LE: loop exit
PB: predicated region body
PF: predicated region fallthrough
CT: control target
= control target key end

     0   :  { %s1222_s0 = inlined_call_operand.vmem [shape: f32[2,8,17], index: 0, kind: input, shape index: {}]   ;;  %s1223_s1 = inlined_call_operand.vmem [shape: f32[2,8,8], index: 1, kind: input, shape index: {}]   ;;  %s1224_s2 = inlined_call_operand.vmem [shape: f32[2,8,4], index: 2, kind: input, shape index: {}]   ;;  %s1225_s3 = inlined_call_operand.vmem [shape: f32[2,8,4], index: 3, kind: input, shape index: {}]   ;;  %s1226_s4 = inlined_call_operand.vmem [shape: f32[2,1,4], index: 4, kind: input, shape index: {}]   ;;  %s1227_s5 = inlined_call_operand.hbm [shape: f32[2,1,8], index: 5, kind: output, shape index: {0}]   ;;  %s1228_s6 = inlined_call_operand.hbm [shape: s32[2,1,8], index: 6, kind: output, shape index: {1}]   ;;  %s1229_s7 = inlined_call_operand.hbm [shape: f32[2,8,8], index: 7, kind: output, shape index: {2}]   ;;  %s1230_s8 = inlined_call_operand.vmem [shape: f32[2,16,4], index: 8, kind: output, shape index: {3}]  }
   0x1   :  { %1233 = sst [smem:[#allocation9_spill]] %s1222_s0 }
   0x2   :  { %1234 = sst [smem:[#allocation10_spill]] %s1223_s1 }
   0x3   :  { %14 = vsyncpa [#allocation3], 0 }
   0x4   :  { %16 = vsyncpa [#allocation3 + $0x1], 0 }
   0x5   :  { %17 = vsyncpa [#allocation5], 0 }
   0x6   :  { %19 = vsyncpa [#allocation5 + $0x1], 0  ;;  %s983_s27 = smov 0   ;;  %s985_s28 = smov 0  }
   0x7   :  { %s987_s29 = smov 0   ;;  %s989_s30 = smov 0  }
   0x8 LB: > { %s1004_s9 = sadd.s32 4294967295, %s931_s30   ;;  %s1231_s10 = sadd.s32 4294967294, %s931_s30   ;;  %s931_s30 = sphi %s989_s30, %s1244_s30   ;;  %s927_s29 = sphi %s987_s29, %s1243_s29   ;;  %s923_s28 = sphi %s985_s28, %s1242_s28   ;;  %s919_s27 = sphi %s983_s27, %s1241_s27  }
   0x9   : > { %s1008_s11 = sadd.s32 1, %s931_s30   ;;  %s162_s12 = sadd.s32 1, %s927_s29 }
   0xa   : > { %s159_s13 = ssub.s32 %s931_s30, %s1008_s11  ;;  %p172_p0 = scmp.ne.s32.totalorder %s927_s29, %s923_s28 }
   0xb   : > { %p160_p1 = scmp.eq.s32.totalorder %s159_s13, 0  ;;  %p173_p2 = scmp.eq.s32.totalorder %s1004_s9, 1 }
   0xc   : > { %p178_p3 = scmp.ne.s32.totalorder %s923_s28, %s919_s27  ;;  %p179_p4 = scmp.eq.s32.totalorder %s1231_s10, 1 }
   0xd   : > { %s1021_s14 = scalar_select %p160_p1, %s927_s29, %s162_s12  }
   0xe   : > { %p1023_p5 = por %p173_p2, %p172_p0  ;;  %p1027_p6 = por %p179_p4, %p178_p3 }
   0xf   : > { %p737_p7 = scmp.ge.s32.totalorder %s931_s30, 1  ;;  %p309_p8 = scmp.lt.s32.totalorder %s931_s30, 3 }
  0x11   : > { %p310_p9 = pnand %p737_p7, %p309_p8 }
  0x12   : > { %p370_p10 = scmp.lt.s32.totalorder (!%p310_p9), %s1004_s9, 1  ;;  %s1237_s0 = sld [smem:[#allocation9_spill]] (!%p310_p9) }
  0x13   : > { %313 = sbr.rel (%p310_p9) target bundleno = 494 (0x1ee), region = 40  ;;  %s933_s25 = smov (!%p310_p9), 126  }
  0x14   : > { %s934_s19 = smov (!%p310_p9), 2   ;;  %s1238_s1 = sld [smem:[#allocation10_spill]] (!%p310_p9) }
  0x15   : > { %s1078_s23 = sand.u32 (!%p310_p9), 1, %s923_s28   ;;  %s935_s12 = smov (!%p310_p9), [#allocation2]  }
  0x18   : > { %s1035_s17 = scalar_select %p370_p10, %s1004_s9, 1  ;;  %vm408_vm0 = vcmask 130048   ;;  %vm395_vm1 = vcmask 138240   ;;  %v415_v5 = vlaneseq  ;;  %vm440_vm4 = vcmask 57344  }
  0x19   : > { %vm455_vm5 = vcmask 64512  }
  0x1a   : > { %s1038_s18 = sshll.u32 %s1035_s17, 3  ;;  %v416_v6 = vand.u32 127, %v415_v5  ;;  %v436_v37 = vshrl.u32 %v415_v5, 7 }
  0x1b   : > { %s373_s21 = scalar_lea.vmem %s1237_s0, %s1038_s18  ;;  %s385_s24 = scalar_lea.vmem %s1225_s3, %s1038_s18 }
  0x1c   : > { %v394_v0 = vld [vmem:[%s373_s21] sm:$0xff]  ;;  %s381_s13 = scalar_lea.vmem %s1224_s2, %s1038_s18  ;;  %s377_s22 = scalar_lea.vmem %s1238_s1, %s1038_s18  ;;  %v1080_v38 = vsub.s32 %v416_v6, %v436_v37 }
  0x1d   : > { %v409_v1 = vsel %vm408_vm0, %v394_v0, -inf  ;;  %v396_v2 = vsel %vm395_vm1, %v394_v0, -inf  ;;  %v1050_v3 = vld [vmem:[%s385_s24] sm:$0xff]  ;;  %s738_s18 = sshll.u32 %s1078_s23, 3  ;;  %s1232_s24 = sshll.u32 %s1004_s9, 4 }
  0x1e   : > { %410 = vmax.xlane.f32.xlu0 %v409_v1  ;;  %v482_v4 = vmul.f32 0.5, %v1050_v3  ;;  %v1058_v12 = vld [vmem:[%s381_s13] sm:$0xff]  ;;  %s1096_s20 = scalar_lea.vmem [#allocation6], %s738_s18  ;;  %s497_s21 = scalar_lea.sflag [#allocation3], %s1078_s23 }
  0x1f   : > { %v459_v13 = vmul.f32 0.5, %v1058_v12  ;;  %v447_v27 = vld [vmem:[%s377_s22] sm:$0xff]  ;;  %s819_s13 = sshll.u32 %s935_s12, 4  ;;  %s820_s13 = int_to_ptr.vmem [resolvable:$false] %s819_s13 }
  0x20   : > { %v745_v28 = vmul.f32 -1.442695, %v447_v27  ;;  %s821_s10 = scalar_lea.vmem %s820_s13, 32 }
  0x22   : > { %397 = vmax.xlane.f32.xlu0 %v396_v2 }
  0x38   : > { %484 = vrot.lane.b32.xlu0 %v482_v4, %s933_s25 }
  0xa7   : > { %v411_v7 = vpop.xlane.xlu0 %410 }
  0xa8   : > { %vm417_vm2 = vcmp.eq.f32.partialorder %v394_v0, %v411_v7 }
  0xa9   : > { %v418_v8 = vsel %vm417_vm2, %v416_v6, 16 }
  0xaa   : > { %v419_v9 = vsel %vm408_vm0, %v418_v8, 2147483647 }
  0xab   : > { %v421_v10 = vshra.s32 %v419_v9, 16  ;;  %v398_v14 = vpop.xlane.xlu0 %397  ;;  %v420_v19 = vand.u32 65535, %v419_v9 }
  0xac   : > { %v399_v15 = vsub.f32 %v394_v0, %v398_v14 }
  0xad   : > { %v423_v11 = vcvt.s32.f32 %v421_v10  ;;  %v422_v21 = vcvt.s32.f32 %v420_v19 }
  0xae   : > { %v400_v16 = vmul.f32 1.442695, %v399_v15 }
  0xaf   : > { %424 = vmin.xlane.f32.xlu1 %v423_v11  ;;  %v1069_v25 = vpop.permute.xlu0 %484 }
  0xb0   : > { %805 = vpow2.f32 %v400_v16  ;;  %v488_v26 = vadd.f32 %v1069_v25, %v1050_v3 }
  0xb1   : > { %807 = vpow2.f32 %v745_v28 }
  0xbd   : > { %v806_v17 = vpop.eup %805 }
  0xbe   : > { %v402_v18 = vsel %vm395_vm1, %v806_v17, 0.0  ;;  %v808_v30 = vpop.eup %807 }
  0xbf   : > { %v451_v33 = vadd.f32 1.0, %v808_v30 }
  0xc0   : > { %461 = vrot.lane.b32.xlu1 %v459_v13, %s933_s25  ;;  %s349_s25 = scalar_lea.vmem [#allocation2], %s1078_s23 }
  0xc1   : > { %s523_s26 = sshll.u32 %s349_s25, 4  ;;  %s1093_s26 = int_to_ptr.vmem [resolvable:$true] %s523_s26 }
  0xc2   : > { %s815_s22 = scalar_lea.vmem %s1093_s26, 16  ;;  %p822_p0 = scmp.lt.s32.totalorder %s1093_s26, %s820_s13 }
  0xc3   : > { %p816_p11 = scmp.ne.s32.totalorder %s1093_s26, %s815_s22  ;;  %p823_p1 = scmp.lt.s32.totalorder %s821_s10, %s815_s22 }
  0xc5   : > { %p817_p12 = pnand %p816_p11, %p1023_p5  ;;  %p824_p2 = por %p823_p1, %p822_p0 }
  0xc7   : > { %p818_p13 = pneg %p817_p12 }
  0xc9   : > { %p825_p3 = pnand %p824_p2, %p818_p13 }
  0xe4   : > { %403 = vadd.xlane.f32.xlu1 %v402_v18 }
 0x138   : > { %v1062_v20 = vpop.xlane.xlu1 %424 }
 0x139   : > { %vm426_vm3 = vcmp.eq.f32.partialorder %v423_v11, %v1062_v20 }
 0x13a   : > { %v427_v22 = vsel %vm426_vm3, %v422_v21, inf }
 0x13b   : > { %428 = vmin.xlane.f32.xlu0 %v427_v22 }
 0x13c   : > { %v1065_v23 = vpop.permute.xlu1 %461 }
 0x13d   : > { %v465_v24 = vadd.f32 %v1065_v23, %v1058_v12 }
 0x13f   : > { %467 = vrot.lane.b32.xlu1 %v465_v24, %s934_s19 }
 0x151   : > { %490 = vrot.lane.b32.xlu0 %v488_v26, %s934_s19  ;;  %s1091_s19 = scalar_lea.hbm %s1227_s5, %s1232_s24 }
 0x16d   : > { %v404_v29 = vpop.xlane.xlu1 %403 }
 0x16e   : > { %809 = vlog2.f32 %v404_v29 }
 0x16f   : > { %811 = vrcp.f32 %v451_v33 }
 0x17b   : > { %v810_v31 = vpop.eup %809 }
 0x17c   : > { %v406_v32 = vmul.f32 0.6931472, %v810_v31  ;;  %v812_v39 = vpop.eup %811 }
 0x17e   : > { %v407_v34 = vadd.f32 %v406_v32, %v398_v14 }
 0x180   : > { %v412_v35 = vsub.f32 %v411_v7, %v407_v34 }
 0x182   : > { %v413_v36 = vmul.f32 1.442695, %v412_v35 }
 0x184   : > { %813 = vpow2.f32 %v413_v36 }
 0x191   : > { %v814_v40 = vpop.eup %813 }
 0x192   : > { %v438_v41 = vrot.slane %v814_v40, %v1080_v38  ;;  %v454_v42 = vmul.f32 %v814_v40, %v812_v39 }
 0x194   : > { %441 = vst.msk [vmem:[%s349_s25] sm:$0x1] %vm440_vm4, %v438_v41 }
 0x195   : > { %456 = vst.msk [vmem:[%s1096_s20] sm:$0xff] %vm455_vm5, %v454_v42 }
 0x196   : > { %828 = shalt.err (!%p825_p3)
}
 0x197   : > { %s829_s18 = scalar_lea.hbm %s1091_s19, 16  ;;  %s833_s12 = scalar_lea.hbm %s1227_s5, 32 }
 0x198   : > { %p830_p4 = scmp.ne.s32.totalorder %s1091_s19, %s829_s18  ;;  %p834_p9 = scmp.lt.s32.totalorder %s1091_s19, %s1227_s5 }
 0x199   : > { %p835_p10 = scmp.lt.s32.totalorder %s833_s12, %s829_s18 }
 0x19a   : > { %p831_p7 = pnand %p830_p4, %p1023_p5 }
 0x19b   : > { %p836_p11 = por %p835_p10, %p834_p9 }
 0x19c   : > { %p832_p8 = pneg %p831_p7 }
 0x19e   : > { %p837_p12 = pnand %p836_p11, %p832_p8 }
 0x1a0   : > { %840 = shalt.err (!%p837_p12)
}
 0x1a1   : > { %754 = dma.vmem_to_hbm [thread:$0]  (%p1023_p5), %s1093_s26, 16, %s1091_s19, %s497_s21   ;;  %vm470_vm6 = vcmask 15360   ;;  %v464_v43 = vsub.f32 %v1058_v12, %v1065_v23  ;;  %vm479_vm7 = vcmask 31744   ;;  %v431_v48 = vcvt.f32.s32 %v1062_v20 }
 0x1a2   : > { %s388_s24 = scalar_lea.vmem %s1226_s4, %s1035_s17  ;;  %s753_s13 = sshll.u32 %s1035_s17, 4  ;;  %v487_v52 = vsub.f32 %v1050_v3, %v1069_v25 }
 0x1a3   : > { %v746_v44 = vld [vmem:[%s388_s24] ss:$0 sm:$0xff]  ;;  %s393_s18 = scalar_lea.vmem %s1230_s8, %s753_s13  ;;  %v432_v50 = vshll.u32 %v431_v48, 16  ;;  %s500_s17 = sand.u32 1, %s1004_s9  }
 0x1a4   : > { %s355_s26 = scalar_lea.vmem [#allocation4], %s1078_s23  ;;  %s750_s21 = sshll.u32 %s1004_s9, 7 }
 0x1a5   : > { %s536_s19 = sshll.u32 %s355_s26, 4  ;;  %s549_s25 = sshll.u32 %s1096_s20, 4  ;;  %s1148_s19 = int_to_ptr.vmem [resolvable:$true] %s536_s19  ;;  %s1155_s25 = int_to_ptr.vmem [resolvable:$true] %s549_s25 }
 0x1a6   : > { %s1239_s12 = sshll.u32 %s1004_s9, 4  ;;  %s1153_s20 = scalar_lea.hbm %s1229_s7, %s750_s21 }
 0x1a7   : > { %s1146_s24 = scalar_lea.hbm %s1228_s6, %s1239_s12  ;;  %s1159_s9 = scalar_lea.sflag [#allocation5], %s500_s17 }
 0x1a8   : > { %s841_s0 = scalar_lea.vmem %s1148_s19, 16  ;;  %s936_s1 = smov [#allocation4]  }
 0x1a9   : > { %p842_p13 = scmp.ne.s32.totalorder %s1148_s19, %s841_s0  ;;  %s845_s12 = sshll.u32 %s936_s1, 4  ;;  %s846_s12 = int_to_ptr.vmem [resolvable:$false] %s845_s12 }
 0x1aa   : > { %s847_s10 = scalar_lea.vmem %s846_s12, 32  ;;  %p848_p2 = scmp.lt.s32.totalorder %s1148_s19, %s846_s12 }
 0x1ab   : > { %p843_p0 = pnand %p842_p13, %p1023_p5  ;;  %p849_p3 = scmp.lt.s32.totalorder %s847_s10, %s841_s0 }
 0x1ad   : > { %p844_p1 = pneg %p843_p0  ;;  %p850_p4 = por %p849_p3, %p848_p2 }
 0x1af   : > { %p851_p7 = pnand %p850_p4, %p844_p1 }
 0x1b1   : > { %v468_v45 = vpop.permute.xlu1 %467 }
 0x1b2   : > { %v471_v46 = vsel %vm470_vm6, %v464_v43, %v468_v45 }
 0x1b3   : > { %v478_v47 = vmul.f32 %v746_v44, %v471_v46 }
 0x1b5   : > { %480 = vst.msk [vmem:[%s393_s18] sm:$0xff] %vm479_vm7, %v478_v47 }
 0x1c4   : > { %v429_v49 = vpop.xlane.xlu0 %428 }
 0x1c5   : > { %v430_v51 = vcvt.f32.s32 %v429_v49 }
 0x1c7   : > { %v433_v53 = vadd.s32 %v432_v50, %v430_v51 }
 0x1c8   : > { %v491_v54 = vpop.permute.xlu0 %490 }
 0x1c9   : > { %v445_v55 = vrot.slane %v433_v53, %v1080_v38  ;;  %v493_v56 = vsel %vm470_vm6, %v487_v52, %v491_v54 }
 0x1ca   : > { %v494_v57 = vmul.f32 %v746_v44, %v493_v56 }
 0x1cb   : > { %446 = vst.msk [vmem:[%s355_s26] sm:$0x1] %vm440_vm4, %v445_v55 }
 0x1cc   : > { %495 = vst.msk [vmem:[%s393_s18 + $0x8] sm:$0xff] %vm479_vm7, %v494_v57 }
 0x1cd   : > { %854 = shalt.err (!%p851_p7)
}
 0x1ce   : > { %s855_s18 = scalar_lea.hbm %s1146_s24, 16  ;;  %s859_s21 = scalar_lea.hbm %s1228_s6, 32 }
 0x1cf   : > { %p856_p8 = scmp.ne.s32.totalorder %s1146_s24, %s855_s18  ;;  %p860_p11 = scmp.lt.s32.totalorder %s1146_s24, %s1228_s6 }
 0x1d0   : > { %p861_p12 = scmp.lt.s32.totalorder %s859_s21, %s855_s18 }
 0x1d1   : > { %p857_p9 = pnand %p856_p8, %p1023_p5 }
 0x1d2   : > { %p862_p13 = por %p861_p12, %p860_p11 }
 0x1d3   : > { %p858_p10 = pneg %p857_p9 }
 0x1d5   : > { %p863_p0 = pnand %p862_p13, %p858_p10 }
 0x1d7   : > { %866 = shalt.err (!%p863_p0)
}
 0x1d8   : > { %755 = dma.vmem_to_hbm [thread:$0]  (%p1023_p5), %s1148_s19, 16, %s1146_s24, %s1159_s9  }
 0x1d9   : > { %s867_s13 = scalar_lea.vmem %s1155_s25, 128  ;;  %s937_s0 = smov [#allocation6]  }
 0x1da   : > { %p868_p1 = scmp.ne.s32.totalorder %s1155_s25, %s867_s13  ;;  %s871_s1 = sshll.u32 %s937_s0, 4  ;;  %s872_s1 = int_to_ptr.vmem [resolvable:$false] %s871_s1 }
 0x1db   : > { %s873_s12 = scalar_lea.vmem %s872_s1, 256  ;;  %p874_p4 = scmp.lt.s32.totalorder %s1155_s25, %s872_s1 }
 0x1dc   : > { %p869_p2 = pnand %p868_p1, %p1023_p5  ;;  %p875_p7 = scmp.lt.s32.totalorder %s873_s12, %s867_s13 }
 0x1de   : > { %p870_p3 = pneg %p869_p2  ;;  %p876_p8 = por %p875_p7, %p874_p4 }
 0x1e0   : > { %p877_p9 = pnand %p876_p8, %p870_p3 }
 0x1e2   : > { %880 = shalt.err (!%p877_p9)
}
 0x1e3   : > { %s881_s10 = scalar_lea.hbm %s1153_s20, 128  ;;  %s885_s18 = scalar_lea.hbm %s1229_s7, 256 }
 0x1e4   : > { %p882_p10 = scmp.ne.s32.totalorder %s1153_s20, %s881_s10  ;;  %p886_p13 = scmp.lt.s32.totalorder %s1153_s20, %s1229_s7 }
 0x1e5   : > { %p887_p0 = scmp.lt.s32.totalorder %s885_s18, %s881_s10 }
 0x1e6   : > { %p883_p11 = pnand %p882_p10, %p1023_p5 }
 0x1e7   : > { %p888_p1 = por %p887_p0, %p886_p13 }
 0x1e8   : > { %p884_p12 = pneg %p883_p11 }
 0x1ea   : > { %p889_p2 = pnand %p888_p1, %p884_p12 }
 0x1ec   : > { %892 = shalt.err (!%p889_p2)
}
 0x1ed   : > { %756 = dma.vmem_to_hbm [thread:$0]  (%p1023_p5), %s1155_s25, 128, %s1153_s20, %s1159_s9  }
 0x1ee PF: > { %p770_p3 = scmp.ge.s32.totalorder %s931_s30, 2  ;;  %s564_s21 = sand.u32 1, %s919_s27  }
 0x1ef   : > { %s565_s22 = scalar_lea.sflag [#allocation3], %s564_s21 }
 0x1f0   : > { %p761_p4 = pnand %p770_p3, %p1027_p6 }
 0x1f2   : > { %p762_p7 = pneg %p761_p4 }
 0x1f4   : > { %910 = dma.done.wait (%p762_p7), %s565_s22, 16  }
 0x1f5   : > { %912 = vsyncadd (%p762_p7), %s565_s22, 4294967280  ;;  %s1240_s23 = sadd.s32 4294967294, %s931_s30  }
 0x1f6   : > { %s572_s13 = sand.u32 1, %s1240_s23  }
 0x1f7   : > { %s573_s15 = scalar_lea.sflag [#allocation5], %s572_s13 }
 0x1f8   : > { %914 = dma.done.wait (%p762_p7), %s573_s15, 144  }
 0x1f9   : > { %916 = vsyncadd (%p762_p7), %s573_s15, 4294967152  ;;  %p22_p5 = scmp.ge.s32.totalorder %s1008_s11, 4   ;;  %s1241_s27 = smov %s923_s28 }
 0x1fa   : > { %s1242_s28 = smov %s927_s29  ;;  %s1243_s29 = smov %s1021_s14 }
 0x1fb   : > { %s1244_s30 = smov %s1008_s11  ;;  %24 = sbr.rel (!%p22_p5) target bundleno = 8 (0x8), region = 131 }
 0x200   :  { %594 = vsyncpa [#allocation3], 1 }
 0x201   :  { %596 = vsyncpa [#allocation3 + $0x1], 1 }
 0x202   :  { %597 = vsyncpa [#allocation5], 1 }
 0x203   :  { %599 = vsyncpa [#allocation5 + $0x1], 1 }

</bundles_post_ra>
